<compile_context>
chip_gen: v7x
topology: tpu7x:2x2x1
jax: 0.10.0
libtpu: 0.0.40
codegen_flags: <defaults>
</compile_context>

<pallas_src>
import jax
import jax.numpy as jnp
from jax.experimental import pallas as pl
from jax.experimental.pallas import tpu as pltpu

_IN_FEATURES = 28 * 28  # 784


def _fc_relu_kernel(x_ref, w_ref, b_ref, o_ref):
    # x_ref: (TB, 784) f32 VMEM tile (one batch tile)
    # w_ref: (1, 784)  f32 VMEM tile (same block every step -> resident)
    # b_ref: (1,)      f32 SMEM scalar
    # o_ref: (TB, 1)   f32 VMEM tile
    prod = x_ref[...] * w_ref[...]                     # VPU broadcast multiply
    y = jnp.sum(prod, axis=-1, keepdims=True)          # XLU lane reduce -> (TB, 1)
    y = y + b_ref[0]
    o_ref[...] = jnp.maximum(y, 0.0)                   # ReLU


def simple_fc_forward(x_nchw, weight, bias, *, max_tile=2048):
    """x_nchw: (B, 1, 28, 28) f32; weight: (1, 784) f32; bias: (1,) f32."""
    B = x_nchw.shape[0]
    x2d = x_nchw.reshape(-1, _IN_FEATURES)   # x.view(-1, 784); weight stays (1, 784)
    b1 = bias.reshape(1,)

    # Tile the batch dim. If B <= max_tile, one full-extent block (always a
    # legal block shape regardless of divisibility); otherwise 2048-row tiles
    # (multiple of 8) with the last partial tile handled by Pallas masking.
    TB = B if B <= max_tile else max_tile
    grid = (pl.cdiv(B, TB),)

    out = pl.pallas_call(
        _fc_relu_kernel,
        out_shape=jax.ShapeDtypeStruct((B, 1), jnp.float32),
        grid_spec=pltpu.PrefetchScalarGridSpec(
            num_scalar_prefetch=0,
            grid=grid,
            in_specs=[
                pl.BlockSpec((TB, _IN_FEATURES), lambda i: (i, 0)),   # x batch tile
                pl.BlockSpec((1, _IN_FEATURES), lambda i: (0, 0)),    # weight row (resident)
                pl.BlockSpec(memory_space=pltpu.MemorySpace.SMEM),    # bias scalar
            ],
            out_specs=pl.BlockSpec((TB, 1), lambda i: (i, 0)),
        ),
        compiler_params=pltpu.CompilerParams(
            dimension_semantics=("parallel",),     # shard batch tiles across TCs (v7x)
            vmem_limit_bytes=32 * 1024 * 1024,     # room for 2x ~6.3 MiB x buffers on v5e too
        ),
    )(x2d, weight, b1)
    return out


def init_params(key):
    # Deterministic init mimicking PyTorch nn.Linear default:
    # U(-1/sqrt(fan_in), 1/sqrt(fan_in)) for both weight and bias.
    kw, kb = jax.random.split(key)
    fan_in = _IN_FEATURES
    bound = 1.0 / jnp.sqrt(fan_in)
    weight = jax.random.uniform(kw, (1, fan_in), jnp.float32, -bound, bound)
    bias = jax.random.uniform(kb, (1,), jnp.float32, -bound, bound)
    return weight, bias


if __name__ == "__main__":
    key = jax.random.PRNGKey(0)
    kx, kp = jax.random.split(key)

    B = 8
    x = jax.random.normal(kx, (B, 1, 28, 28), dtype=jnp.float32)
    weight, bias = init_params(kp)

    y = simple_fc_forward(x, weight, bias)
    y = jax.block_until_ready(y)

    # Reference check against plain JAX.
    y_ref = jnp.maximum(x.reshape(-1, _IN_FEATURES) @ weight.T + bias, 0.0)
    assert y.shape == (B, 1)
    assert jnp.allclose(y, y_ref, atol=1e-5, rtol=1e-5)

    print("KERNEL_OK")
</pallas_src>

<mosaic_0001>
module attributes {stable_mosaic.version = 11 : i64} {
  func.func @_fc_relu_kernel(%arg0: i32, %arg1: memref<8x784xf32, #tpu.memory_space<vmem>>, %arg2: memref<1x784xf32, #tpu.memory_space<vmem>>, %arg3: memref<1xf32, #tpu.memory_space<smem>>, %arg4: memref<8x1xf32, #tpu.memory_space<vmem>>) attributes {dimension_semantics = [#tpu.dimension_semantics<parallel>], iteration_bounds = array<i64: 1>, scalar_prefetch = 0 : i64, scratch_operands = 0 : i64, tpu.core_type = #tpu.core_type<tc>, window_params = [{transform_indices = @transform_0, window_bounds = array<i64: 8, 784>}, {pipeline_mode = #tpu.pipeline_mode<synchronous>, transform_indices = @transform_1, window_bounds = array<i64: 1, 784>}, {transform_indices = @transform_2, window_bounds = array<i64: 1>}, {transform_indices = @transform_3, window_bounds = array<i64: 8, 1>}]} {
    %c0 = arith.constant 0 : index
    %c0_0 = arith.constant 0 : index
    %0 = vector.load %arg1[%c0, %c0_0] : memref<8x784xf32, #tpu.memory_space<vmem>>, vector<8x784xf32>
    %c0_1 = arith.constant 0 : index
    %c0_2 = arith.constant 0 : index
    %1 = vector.load %arg2[%c0_1, %c0_2] : memref<1x784xf32, #tpu.memory_space<vmem>>, vector<1x784xf32>
    %2 = vector.broadcast %1 : vector<1x784xf32> to vector<8x784xf32>
    %3 = arith.mulf %0, %2 : vector<8x784xf32>
    %cst = arith.constant dense<0.000000e+00> : vector<8xf32>
    %4 = vector.multi_reduction <add>, %3, %cst [1] : vector<8x784xf32> to vector<8xf32>
    %5 = vector.shape_cast %4 : vector<8xf32> to vector<8x1xf32>
    %c0_3 = arith.constant 0 : index
    %6 = memref.load %arg3[%c0_3] : memref<1xf32, #tpu.memory_space<smem>>
    %7 = vector.broadcast %6 : f32 to vector<8x1xf32>
    %8 = arith.addf %5, %7 : vector<8x1xf32>
    %cst_4 = arith.constant 0.000000e+00 : f32
    %9 = vector.broadcast %cst_4 : f32 to vector<8x1xf32>
    %10 = arith.maximumf %8, %9 : vector<8x1xf32>
    %c0_5 = arith.constant 0 : index
    %c0_6 = arith.constant 0 : index
    %11 = vector.load %arg4[%c0_5, %c0_6] : memref<8x1xf32, #tpu.memory_space<vmem>>, vector<8x1xf32>
    tpu.vector_store %arg4[%c0_5, %c0_6], %10 {strides = array<i32>} : memref<8x1xf32, #tpu.memory_space<vmem>>, vector<8x1xf32>,
    return
  }
  func.func @transform_0(%arg0: i32) -> (i32, i32) {
    %c0_i32 = arith.constant 0 : i32
    %c0_i32_0 = arith.constant 0 : i32
    return %arg0, %c0_i32 : i32, i32
  }
  func.func @transform_1(%arg0: i32) -> (i32, i32) {
    %c0_i32 = arith.constant 0 : i32
    %c0_i32_0 = arith.constant 0 : i32
    %c0_i32_1 = arith.constant 0 : i32
    return %c0_i32, %c0_i32_0 : i32, i32
  }
  func.func @transform_2(%arg0: i32) -> i32 {
    %c0_i32 = arith.constant 0 : i32
    %c0_i32_0 = arith.constant 0 : i32
    return %c0_i32 : i32
  }
  func.func @transform_3(%arg0: i32) -> (i32, i32) {
    %c0_i32 = arith.constant 0 : i32
    %c0_i32_0 = arith.constant 0 : i32
    return %arg0, %c0_i32 : i32, i32
  }
}

</mosaic_0001>

<bundles_post_ra>
// kernel: tpu_custom_call.1
= control target key start
LH: loop header
LB: loop body
LE: loop exit
PB: predicated region body
PF: predicated region fallthrough
CT: control target
= control target key end

     0   :  { %9 = vsyncpa [#allocation4], 0  ;;  %s124_s12 = smov [#allocation3]   ;;  %s166_s0 = inlined_call_operand.hbm [shape: f32[8,784], index: 0, kind: input, shape index: {}]   ;;  %s167_s1 = inlined_call_operand.vmem [shape: f32[1,784], index: 1, kind: input, shape index: {}]   ;;  %s168_s2 = inlined_call_operand.<no memory space> [shape: f32[1], index: 2, kind: input, shape index: {}]   ;;  %s169_s3 = inlined_call_operand.vmem [shape: f32[8,1], index: 3, kind: output, shape index: {}]  }
   0x1   :  { %s16_s13 = sshll.u32 %s124_s12, 4  ;;  %s100_s16 = scalar_lea.hbm %s166_s0, 896  ;;  %s17_s13 = int_to_ptr.vmem [resolvable:$true] %s16_s13 }
   0x2   :  { %p101_p0 = scmp.ne.s32.totalorder %s166_s0, %s100_s16  ;;  %p104_p1 = scmp.lt.u32.totalorder %s100_s16, %s166_s0 }
   0x4   :  { %p106_p2 = pnand %p104_p1, %p101_p0 }
   0x6   :  { %109 = shalt.err (!%p106_p2)
}
   0x7   :  { %s110_s21 = scalar_lea.vmem %s17_s13, 896  ;;  %p115_p4 = scmp.lt.s32.totalorder %s17_s13, %s17_s13 }
   0x8   :  { %p111_p3 = scmp.ne.s32.totalorder %s17_s13, %s110_s21  ;;  %p116_p5 = scmp.lt.s32.totalorder %s110_s21, %s110_s21 }
   0xa   :  { %p117_p6 = por %p116_p5, %p115_p4 }
   0xc   :  { %p118_p7 = pnand %p117_p6, %p111_p3 }
   0xe   :  { %121 = shalt.err (!%p118_p7)
}
   0xf   :  { %19 = dma.hbm_to_vmem [thread:$0]  %s166_s0, 896, %s17_s13, [#allocation4]  }
  0x10   :  { %122 = dma.done.wait [#allocation4], 896  }
  0x11   :  { %123 = vsyncadd [#allocation4], 4294966400  ;;  %v36_v0 = vlaneseq  ;;  %v27_v6 = vld [vmem:[#allocation3] sm:$0xff]  ;;  %v28_v8 = vld [vmem:[#allocation3 + $0x8] sm:$0xff]  ;;  %vm83_vm0 = vcmask 130048   ;;  %v89_v38 = vstv %s168_s2  ;;  %vm92_vm1 = vcmask 7168  }
  0x12   :  { %v29_v9 = vld [vmem:[#allocation3 + $0x10] sm:$0xff]  ;;  %v34_v10 = vld [vmem:[%s167_s1] sm:$0x7f]  ;;  %v30_v17 = vld [vmem:[#allocation3 + $0x18] sm:$0xff] }
  0x13   :  { %v37_v1 = vshrl.u32 %v36_v0, 7  ;;  %v31_v22 = vld [vmem:[#allocation3 + $0x20] sm:$0xff]  ;;  %v33_v24 = vld [vmem:[#allocation3 + $0x30] sm:$0xff]  ;;  %v32_v28 = vld [vmem:[#allocation3 + $0x28] sm:$0xff] }
  0x15   :  { %v38_v2 = vsub.s32 0, %v37_v1  ;;  %v42_v3 = vsub.s32 1, %v37_v1  ;;  %v46_v4 = vsub.s32 2, %v37_v1  ;;  %v50_v5 = vsub.s32 3, %v37_v1 }
  0x16   :  { %v54_v7 = vsub.s32 4, %v37_v1  ;;  %v58_v11 = vsub.s32 5, %v37_v1  ;;  %v62_v12 = vsub.s32 6, %v37_v1 }
  0x17   :  { %v39_v13 = vrot.slane %v34_v10, %v38_v2  ;;  %v43_v14 = vrot.slane %v34_v10, %v42_v3  ;;  %v47_v15 = vrot.slane %v34_v10, %v46_v4  ;;  %v51_v16 = vrot.slane %v34_v10, %v50_v5 }
  0x18   :  { %v55_v18 = vrot.slane %v34_v10, %v54_v7  ;;  %v63_v23 = vrot.slane %v34_v10, %v62_v12  ;;  %v59_v25 = vrot.slane %v34_v10, %v58_v11 }
  0x19   :  { %v71_v19 = vmul.f32 %v39_v13, %v27_v6  ;;  %v72_v20 = vmul.f32 %v43_v14, %v28_v8  ;;  %v73_v21 = vmul.f32 %v47_v15, %v29_v9  ;;  %v74_v26 = vmul.f32 %v51_v16, %v30_v17 }
  0x1a   :  { %v75_v29 = vmul.f32 %v55_v18, %v31_v22  ;;  %v77_v31 = vmul.f32 %v63_v23, %v33_v24  ;;  %v76_v32 = vmul.f32 %v59_v25, %v32_v28 }
  0x1b   :  { %v78_v27 = vadd.f32 %v72_v20, %v71_v19 }
  0x1c   :  { %v84_v35 = vsel %vm83_vm0, %v77_v31, 0.0 }
  0x1d   :  { %v79_v30 = vadd.f32 %v78_v27, %v73_v21 }
  0x1f   :  { %v80_v33 = vadd.f32 %v79_v30, %v74_v26 }
  0x21   :  { %v81_v34 = vadd.f32 %v80_v33, %v75_v29 }
  0x23   :  { %v82_v36 = vadd.f32 %v81_v34, %v76_v32 }
  0x25   :  { %v85_v37 = vadd.f32 %v84_v35, %v82_v36 }
  0x27   :  { %86 = vadd.xlane.f32.xlu0 %v85_v37 }
  0xb4   :  { %v87_v39 = vpop.xlane.xlu0 %86 }
  0xb5   :  { %v90_v40 = vadd.f32 %v89_v38, %v87_v39 }
  0xb7   :  { %v91_v41 = vmax.f32 %v90_v40, 0.0 }
  0xb9   :  { %93 = vst.msk [vmem:[%s169_s3] sm:$0xff] %vm92_vm1, %v91_v41 }
  0xba   :  { %98 = vsyncpa [#allocation4], 1 }

</bundles_post_ra>
